<compile_context>
chip_gen: v7x
topology: tpu7x:2x2x1
jax: 0.10.0
libtpu: 0.0.40
codegen_flags: <defaults>
</compile_context>

<pallas_src>
import jax
import jax.numpy as jnp
from jax.experimental import pallas as pl
from jax.experimental.pallas import tpu as pltpu


# ---------------------------------------------------------------------------
# Fused Pallas kernel: encoder -> reparameterize -> decoder (per row tile)
# ---------------------------------------------------------------------------

def _vae_fused_kernel(x_ref, ew1_ref, eb1_ref, ewml_ref, ebml_ref, eps_ref,
                      dw1_ref, db1_ref, dw2_ref, db2_ref,
                      mulv_ref, z_ref, recon_ref):
    # ---- encoder: h = tanh(x @ W1 + b1)  (bf16 operands, f32 accumulation) --
    h = jnp.tanh(
        jnp.dot(x_ref[...], ew1_ref[...], preferred_element_type=jnp.float32)
        + eb1_ref[...]
    )
    # merged [mu || logvar] projection -> lane-dense (tm, 2*Lp) slab
    mulv = (
        jnp.dot(h.astype(jnp.bfloat16), ewml_ref[...],
                preferred_element_type=jnp.float32)
        + ebml_ref[...]
    )
    mulv_ref[...] = mulv

    lp = mulv.shape[-1] // 2              # padded latent width (multiple of 128)
    mu = mulv[:, :lp]                     # lane-aligned slices (no masked ops)
    logvar = mulv[:, lp:]

    # ---- reparameterized sample (f32): z = mu + exp(0.5*logvar) * eps -------
    sigma = jnp.exp(0.5 * logvar)
    z = mu[None, :, :] + sigma[None, :, :] * eps_ref[...]      # (S, tm, Lp)
    z_ref[...] = z

    # ---- decoder on the folded (S*tm) rows of this tile ---------------------
    s, tm, _ = eps_ref.shape
    zf = z.reshape(s * tm, lp).astype(jnp.bfloat16)   # tile-preserving reshape
    h2 = jnp.tanh(
        jnp.dot(zf, dw1_ref[...], preferred_element_type=jnp.float32)
        + db1_ref[...]
    )
    recon = (
        jnp.dot(h2.astype(jnp.bfloat16), dw2_ref[...],
                preferred_element_type=jnp.float32)
        + db2_ref[...]
    )
    recon_ref[...] = recon.reshape(s, tm, recon.shape[-1])


# ---------------------------------------------------------------------------
# Wrapper helpers: padding + tile sizing
# ---------------------------------------------------------------------------

def _round_up(n, m):
    return ((n + m - 1) // m) * m


def _pad2d(a, rows, cols, dtype=None):
    r, c = a.shape
    out = jnp.pad(a, ((0, rows - r), (0, cols - c)))
    return out if dtype is None else out.astype(dtype)


def _tile_act_bytes(tm, S, Dp, Hp, Lp):
    """Per-step VMEM for activations: double-buffered I/O tiles + f32 temps."""
    io = 2 * (tm * Dp * 2            # x tile (bf16)
              + S * tm * Lp * 4      # eps tile
              + tm * 2 * Lp * 4      # mulv output tile
              + S * tm * Lp * 4      # z output tile
              + S * tm * Dp * 4)     # recon output tile
    mid = tm * Hp * 4 + S * tm * (Hp + Lp + Dp) * 4
    return io + mid


def _choose_row_tile(B, S, Dp, Hp, Lp, act_budget):
    """Largest row tile (multiple of 16, bf16 sublane packing) within budget."""
    cap = max(16, _round_up(B, 16))
    tm = 16
    while 2 * tm <= min(cap, 256) and _tile_act_bytes(2 * tm, S, Dp, Hp, Lp) <= act_budget:
        tm *= 2
    return tm


# ---------------------------------------------------------------------------
# Wrapper: pad to lane/sublane-dense shapes, one row-gridded pallas_call, slice
# ---------------------------------------------------------------------------

def vae_forward(params, x, eps):
    """
    x:   (B, D_in)   input
    eps: (S, B, L)   standard-normal noise for q_z.rsample([S])

    Returns dict mimicking VAEOutput sufficient statistics:
      q_z_mu / q_z_logvar : (B, L)
      z                   : (S, B, L)
      p_xgivenz_loc       : (S*B, D_in)   (loc of unit-scale Normal likelihood)
    """
    B, Din = x.shape
    S, _, L = eps.shape
    H = params["enc_w1"].shape[1]

    # lane axis -> multiples of 128
    Dp = _round_up(Din, 128)
    Hp = _round_up(H, 128)
    Lp = _round_up(L, 128)

    # weights live in VMEM for the whole kernel (bf16) + f32 biases
    w_bytes = ((Dp * Hp + Hp * 2 * Lp + Lp * Hp + Hp * Dp) * 2
               + (Hp + 2 * Lp + Hp + Dp) * 4)
    # activation budget sized for v7x (64 MiB physical / 32 MiB scoped default)
    act_budget = max(2 * 2 ** 20, 20 * 2 ** 20 - w_bytes)
    tm = _choose_row_tile(B, S, Dp, Hp, Lp, act_budget)
    Bp = _round_up(B, tm)                 # row axis padded to the tile (mult of 16)
    grid = (Bp // tm,)

    bf16 = jnp.bfloat16
    xp = _pad2d(x, Bp, Dp, bf16)
    ew1 = _pad2d(params["enc_w1"], Dp, Hp, bf16)
    eb1 = _pad2d(params["enc_b1"], 1, Hp)
    # merged [mu || logvar] projection, each half padded to Lp lanes
    ewml = jnp.concatenate(
        [_pad2d(params["enc_wmu"], Hp, Lp, bf16),
         _pad2d(params["enc_wlv"], Hp, Lp, bf16)], axis=1)
    ebml = jnp.concatenate(
        [_pad2d(params["enc_bmu"], 1, Lp), _pad2d(params["enc_blv"], 1, Lp)], axis=1)
    epsp = jnp.pad(eps, ((0, 0), (0, Bp - B), (0, Lp - L)))
    dw1 = _pad2d(params["dec_w1"], Lp, Hp, bf16)
    db1 = _pad2d(params["dec_b1"], 1, Hp)
    dw2 = _pad2d(params["dec_w2"], Hp, Dp, bf16)
    db2 = _pad2d(params["dec_b2"], 1, Dp)

    const = lambda i: (0, 0)              # pinned weights/biases: fetched once
    in_specs = [
        pl.BlockSpec((tm, Dp), lambda i: (i, 0)),          # x row tile
        pl.BlockSpec((Dp, Hp), const),                     # enc W1
        pl.BlockSpec((1, Hp), const),                      # enc b1
        pl.BlockSpec((Hp, 2 * Lp), const),                 # enc W[mu||lv]
        pl.BlockSpec((1, 2 * Lp), const),                  # enc b[mu||lv]
        pl.BlockSpec((S, tm, Lp), lambda i: (0, i, 0)),    # eps row tile
        pl.BlockSpec((Lp, Hp), const),                     # dec W1
        pl.BlockSpec((1, Hp), const),                      # dec b1
        pl.BlockSpec((Hp, Dp), const),                     # dec W2
        pl.BlockSpec((1, Dp), const),                      # dec b2
    ]
    out_specs = (
        pl.BlockSpec((tm, 2 * Lp), lambda i: (i, 0)),      # [mu || logvar]
        pl.BlockSpec((S, tm, Lp), lambda i: (0, i, 0)),    # z
        pl.BlockSpec((S, tm, Dp), lambda i: (0, i, 0)),    # decoder loc
    )
    out_shape = (
        jax.ShapeDtypeStruct((Bp, 2 * Lp), jnp.float32),
        jax.ShapeDtypeStruct((S, Bp, Lp), jnp.float32),
        jax.ShapeDtypeStruct((S, Bp, Dp), jnp.float32),
    )

    flops = 2 * (Bp * Dp * Hp + Bp * Hp * 2 * Lp + S * Bp * (Lp * Hp + Hp * Dp))
    transcendentals = Bp * Hp + Bp * Lp + S * Bp * Hp
    ins = (xp, ew1, eb1, ewml, ebml, epsp, dw1, db1, dw2, db2)
    in_bytes = sum(a.size * a.dtype.itemsize for a in ins)
    out_bytes = 4 * (Bp * 2 * Lp + S * Bp * Lp + S * Bp * Dp)

    vmem_limit = int(min(
        32 * 2 ** 20,
        max(8 * 2 ** 20, 2 * (w_bytes + _tile_act_bytes(tm, S, Dp, Hp, Lp)))))

    mulv_p, z_p, recon_p = pl.pallas_call(
        _vae_fused_kernel,
        grid=grid,
        in_specs=in_specs,
        out_specs=out_specs,
        out_shape=out_shape,
        compiler_params=pltpu.CompilerParams(
            dimension_semantics=("parallel",),     # v7x: split row tiles over 2 TCs
            vmem_limit_bytes=vmem_limit),
        cost_estimate=pl.CostEstimate(
            flops=int(flops),
            transcendentals=int(transcendentals),
            bytes_accessed=int(in_bytes + out_bytes)),
    )(*ins)

    mu = mulv_p[:B, :L]
    logvar = mulv_p[:B, Lp:Lp + L]
    z = z_p[:, :B, :L]
    recon_loc = recon_p[:, :B, :Din].reshape(S * B, Din)

    # TODO(synk): torch.distributions objects (q_z, p_xgivenz) have no Pallas
    # equivalent; we return their sufficient statistics instead.
    return {"q_z_mu": mu, "q_z_logvar": logvar, "z": z, "p_xgivenz_loc": recon_loc}


# ---------------------------------------------------------------------------
# Pure-JAX reference (mirrors VAE.forward) for correctness checking
# ---------------------------------------------------------------------------

def vae_forward_ref(params, x, eps):
    h = jnp.tanh(x @ params["enc_w1"] + params["enc_b1"])
    mu = h @ params["enc_wmu"] + params["enc_bmu"]
    logvar = h @ params["enc_wlv"] + params["enc_blv"]
    z = mu[None] + jnp.exp(0.5 * logvar)[None] * eps
    S, B, L = z.shape
    zf = z.reshape(S * B, L)
    h2 = jnp.tanh(zf @ params["dec_w1"] + params["dec_b1"])
    recon = h2 @ params["dec_w2"] + params["dec_b2"]
    return {"q_z_mu": mu, "q_z_logvar": logvar, "z": z, "p_xgivenz_loc": recon}


# ---------------------------------------------------------------------------
# Deterministic parameter init + demo
# ---------------------------------------------------------------------------

def init_params(key, dim_input, dim_hidden, dim_latent):
    ks = jax.random.split(key, 10)
    s = 0.1
    return {
        "enc_w1": s * jax.random.normal(ks[0], (dim_input, dim_hidden), jnp.float32),
        "enc_b1": s * jax.random.normal(ks[1], (1, dim_hidden), jnp.float32),
        "enc_wmu": s * jax.random.normal(ks[2], (dim_hidden, dim_latent), jnp.float32),
        "enc_bmu": s * jax.random.normal(ks[3], (1, dim_latent), jnp.float32),
        "enc_wlv": s * jax.random.normal(ks[4], (dim_hidden, dim_latent), jnp.float32),
        "enc_blv": s * jax.random.normal(ks[5], (1, dim_latent), jnp.float32),
        "dec_w1": s * jax.random.normal(ks[6], (dim_latent, dim_hidden), jnp.float32),
        "dec_b1": s * jax.random.normal(ks[7], (1, dim_hidden), jnp.float32),
        "dec_w2": s * jax.random.normal(ks[8], (dim_hidden, dim_input), jnp.float32),
        "dec_b2": s * jax.random.normal(ks[9], (1, dim_input), jnp.float32),
    }


if __name__ == "__main__":
    dim_input, dim_hidden, dim_latent = 16, 32, 8
    batch, sampling = 40, 3          # -> Bp=64, row tile 32, grid=(2,) (exercised)

    root = jax.random.PRNGKey(0)
    k_param, k_x, k_eps = jax.random.split(root, 3)

    params = init_params(k_param, dim_input, dim_hidden, dim_latent)
    x = jax.random.normal(k_x, (batch, dim_input), jnp.float32)
    eps = jax.random.normal(k_eps, (sampling, batch, dim_latent), jnp.float32)

    out = jax.jit(vae_forward)(params, x, eps)
    jax.block_until_ready(out)

    # shape checks (mirror VAEOutput)
    assert out["q_z_mu"].shape == (batch, dim_latent)
    assert out["q_z_logvar"].shape == (batch, dim_latent)
    assert out["z"].shape == (sampling, batch, dim_latent)
    assert out["p_xgivenz_loc"].shape == (sampling * batch, dim_input)

    # numerical check against pure-f32 reference (tolerance loosened for bf16
    # matmul operands; accumulation + transcendentals remain f32)
    ref = vae_forward_ref(params, x, eps)
    for k in ("q_z_mu", "q_z_logvar", "z", "p_xgivenz_loc"):
        assert jnp.allclose(out[k], ref[k], atol=3e-2, rtol=3e-2), k

    print("KERNEL_OK")
</pallas_src>

<mosaic_0001>
module attributes {stable_mosaic.version = 11 : i64} {
  func.func @_vae_fused_kernel(%arg0: i32, %arg1: memref<32x128xbf16, #tpu.memory_space<vmem>>, %arg2: memref<128x128xbf16, #tpu.memory_space<vmem>>, %arg3: memref<1x128xf32, #tpu.memory_space<vmem>>, %arg4: memref<128x256xbf16, #tpu.memory_space<vmem>>, %arg5: memref<1x256xf32, #tpu.memory_space<vmem>>, %arg6: memref<3x32x128xf32, #tpu.memory_space<vmem>>, %arg7: memref<128x128xbf16, #tpu.memory_space<vmem>>, %arg8: memref<1x128xf32, #tpu.memory_space<vmem>>, %arg9: memref<128x128xbf16, #tpu.memory_space<vmem>>, %arg10: memref<1x128xf32, #tpu.memory_space<vmem>>, %arg11: memref<32x256xf32, #tpu.memory_space<vmem>>, %arg12: memref<3x32x128xf32, #tpu.memory_space<vmem>>, %arg13: memref<3x32x128xf32, #tpu.memory_space<vmem>>) attributes {dimension_semantics = [#tpu.dimension_semantics<parallel>], iteration_bounds = array<i64: 2>, scalar_prefetch = 0 : i64, scratch_operands = 0 : i64, tpu.core_type = #tpu.core_type<tc>, window_params = [{transform_indices = @transform_0, window_bounds = array<i64: 32, 128>}, {pipeline_mode = #tpu.pipeline_mode<synchronous>, transform_indices = @transform_1, window_bounds = array<i64: 128, 128>}, {pipeline_mode = #tpu.pipeline_mode<synchronous>, transform_indices = @transform_2, window_bounds = array<i64: 1, 128>}, {pipeline_mode = #tpu.pipeline_mode<synchronous>, transform_indices = @transform_3, window_bounds = array<i64: 128, 256>}, {pipeline_mode = #tpu.pipeline_mode<synchronous>, transform_indices = @transform_4, window_bounds = array<i64: 1, 256>}, {transform_indices = @transform_5, window_bounds = array<i64: 3, 32, 128>}, {pipeline_mode = #tpu.pipeline_mode<synchronous>, transform_indices = @transform_6, window_bounds = array<i64: 128, 128>}, {pipeline_mode = #tpu.pipeline_mode<synchronous>, transform_indices = @transform_7, window_bounds = array<i64: 1, 128>}, {pipeline_mode = #tpu.pipeline_mode<synchronous>, transform_indices = @transform_8, window_bounds = array<i64: 128, 128>}, {pipeline_mode = #tpu.pipeline_mode<synchronous>, transform_indices = @transform_9, window_bounds = array<i64: 1, 128>}, {transform_indices = @transform_10, window_bounds = array<i64: 32, 256>}, {transform_indices = @transform_11, window_bounds = array<i64: 3, 32, 128>}, {transform_indices = @transform_12, window_bounds = array<i64: 3, 32, 128>}]} {
    %c0 = arith.constant 0 : index
    %c0_0 = arith.constant 0 : index
    %0 = vector.load %arg1[%c0, %c0_0] : memref<32x128xbf16, #tpu.memory_space<vmem>>, vector<32x128xbf16>
    %c0_1 = arith.constant 0 : index
    %c0_2 = arith.constant 0 : index
    %1 = vector.load %arg2[%c0_1, %c0_2] : memref<128x128xbf16, #tpu.memory_space<vmem>>, vector<128x128xbf16>
    %cst = arith.constant dense<0.000000e+00> : vector<32x128xf32>
    %2 = tpu.matmul %0, %1, %cst {dimension_numbers = #tpu.dot_dimension_numbers<[1], [0], [0], [1], [0, 0, 1, 1], [], []>} : vector<32x128xbf16>, vector<128x128xbf16>, vector<32x128xf32> -> vector<32x128xf32>
    %c0_3 = arith.constant 0 : index
    %c0_4 = arith.constant 0 : index
    %3 = vector.load %arg3[%c0_3, %c0_4] : memref<1x128xf32, #tpu.memory_space<vmem>>, vector<1x128xf32>
    %4 = vector.broadcast %3 : vector<1x128xf32> to vector<32x128xf32>
    %5 = arith.addf %2, %4 : vector<32x128xf32>
    %6 = math.tanh %5 : vector<32x128xf32>
    %7 = arith.truncf %6 : vector<32x128xf32> to vector<32x128xbf16>
    %c0_5 = arith.constant 0 : index
    %c0_6 = arith.constant 0 : index
    %8 = vector.load %arg4[%c0_5, %c0_6] : memref<128x256xbf16, #tpu.memory_space<vmem>>, vector<128x256xbf16>
    %cst_7 = arith.constant dense<0.000000e+00> : vector<32x256xf32>
    %9 = tpu.matmul %7, %8, %cst_7 {dimension_numbers = #tpu.dot_dimension_numbers<[1], [0], [0], [1], [0, 0, 1, 1], [], []>} : vector<32x128xbf16>, vector<128x256xbf16>, vector<32x256xf32> -> vector<32x256xf32>
    %c0_8 = arith.constant 0 : index
    %c0_9 = arith.constant 0 : index
    %10 = vector.load %arg5[%c0_8, %c0_9] : memref<1x256xf32, #tpu.memory_space<vmem>>, vector<1x256xf32>
    %11 = vector.broadcast %10 : vector<1x256xf32> to vector<32x256xf32>
    %12 = arith.addf %9, %11 : vector<32x256xf32>
    %c0_10 = arith.constant 0 : index
    %c0_11 = arith.constant 0 : index
    %13 = vector.load %arg11[%c0_10, %c0_11] : memref<32x256xf32, #tpu.memory_space<vmem>>, vector<32x256xf32>
    tpu.vector_store %arg11[%c0_10, %c0_11], %12 {strides = array<i32>} : memref<32x256xf32, #tpu.memory_space<vmem>>, vector<32x256xf32>,
    %14 = vector.extract_strided_slice %12 {offsets = [0, 0], sizes = [32, 128], strides = [1, 1]} : vector<32x256xf32> to vector<32x128xf32>
    %15 = vector.extract_strided_slice %12 {offsets = [0, 128], sizes = [32, 128], strides = [1, 1]} : vector<32x256xf32> to vector<32x128xf32>
    %cst_12 = arith.constant 5.000000e-01 : f32
    %16 = vector.broadcast %cst_12 : f32 to vector<32x128xf32>
    %17 = arith.mulf %16, %15 : vector<32x128xf32>
    %18 = math.exp %17 : vector<32x128xf32>
    %19 = vector.shape_cast %14 : vector<32x128xf32> to vector<1x32x128xf32>
    %20 = vector.shape_cast %18 : vector<32x128xf32> to vector<1x32x128xf32>
    %c0_13 = arith.constant 0 : index
    %c0_14 = arith.constant 0 : index
    %c0_15 = arith.constant 0 : index
    %21 = vector.load %arg6[%c0_13, %c0_14, %c0_15] : memref<3x32x128xf32, #tpu.memory_space<vmem>>, vector<3x32x128xf32>
    %22 = vector.broadcast %20 : vector<1x32x128xf32> to vector<3x32x128xf32>
    %23 = arith.mulf %22, %21 : vector<3x32x128xf32>
    %24 = vector.broadcast %19 : vector<1x32x128xf32> to vector<3x32x128xf32>
    %25 = arith.addf %24, %23 : vector<3x32x128xf32>
    %c0_16 = arith.constant 0 : index
    %c0_17 = arith.constant 0 : index
    %c0_18 = arith.constant 0 : index
    %26 = vector.load %arg12[%c0_16, %c0_17, %c0_18] : memref<3x32x128xf32, #tpu.memory_space<vmem>>, vector<3x32x128xf32>
    tpu.vector_store %arg12[%c0_16, %c0_17, %c0_18], %25 {strides = array<i32>} : memref<3x32x128xf32, #tpu.memory_space<vmem>>, vector<3x32x128xf32>,
    %27 = vector.shape_cast %25 : vector<3x32x128xf32> to vector<96x128xf32>
    %28 = arith.truncf %27 : vector<96x128xf32> to vector<96x128xbf16>
    %c0_19 = arith.constant 0 : index
    %c0_20 = arith.constant 0 : index
    %29 = vector.load %arg7[%c0_19, %c0_20] : memref<128x128xbf16, #tpu.memory_space<vmem>>, vector<128x128xbf16>
    %cst_21 = arith.constant dense<0.000000e+00> : vector<96x128xf32>
    %30 = tpu.matmul %28, %29, %cst_21 {dimension_numbers = #tpu.dot_dimension_numbers<[1], [0], [0], [1], [0, 0, 1, 1], [], []>} : vector<96x128xbf16>, vector<128x128xbf16>, vector<96x128xf32> -> vector<96x128xf32>
    %c0_22 = arith.constant 0 : index
    %c0_23 = arith.constant 0 : index
    %31 = vector.load %arg8[%c0_22, %c0_23] : memref<1x128xf32, #tpu.memory_space<vmem>>, vector<1x128xf32>
    %32 = vector.broadcast %31 : vector<1x128xf32> to vector<96x128xf32>
    %33 = arith.addf %30, %32 : vector<96x128xf32>
    %34 = math.tanh %33 : vector<96x128xf32>
    %35 = arith.truncf %34 : vector<96x128xf32> to vector<96x128xbf16>
    %c0_24 = arith.constant 0 : index
    %c0_25 = arith.constant 0 : index
    %36 = vector.load %arg9[%c0_24, %c0_25] : memref<128x128xbf16, #tpu.memory_space<vmem>>, vector<128x128xbf16>
    %cst_26 = arith.constant dense<0.000000e+00> : vector<96x128xf32>
    %37 = tpu.matmul %35, %36, %cst_26 {dimension_numbers = #tpu.dot_dimension_numbers<[1], [0], [0], [1], [0, 0, 1, 1], [], []>} : vector<96x128xbf16>, vector<128x128xbf16>, vector<96x128xf32> -> vector<96x128xf32>
    %c0_27 = arith.constant 0 : index
    %c0_28 = arith.constant 0 : index
    %38 = vector.load %arg10[%c0_27, %c0_28] : memref<1x128xf32, #tpu.memory_space<vmem>>, vector<1x128xf32>
    %39 = vector.broadcast %38 : vector<1x128xf32> to vector<96x128xf32>
    %40 = arith.addf %37, %39 : vector<96x128xf32>
    %41 = vector.shape_cast %40 : vector<96x128xf32> to vector<3x32x128xf32>
    %c0_29 = arith.constant 0 : index
    %c0_30 = arith.constant 0 : index
    %c0_31 = arith.constant 0 : index
    %42 = vector.load %arg13[%c0_29, %c0_30, %c0_31] : memref<3x32x128xf32, #tpu.memory_space<vmem>>, vector<3x32x128xf32>
    tpu.vector_store %arg13[%c0_29, %c0_30, %c0_31], %41 {strides = array<i32>} : memref<3x32x128xf32, #tpu.memory_space<vmem>>, vector<3x32x128xf32>,
    return
  }
  func.func @transform_0(%arg0: i32) -> (i32, i32) {
    %c0_i32 = arith.constant 0 : i32
    %c0_i32_0 = arith.constant 0 : i32
    return %arg0, %c0_i32 : i32, i32
  }
  func.func @transform_1(%arg0: i32) -> (i32, i32) {
    %c0_i32 = arith.constant 0 : i32
    %c0_i32_0 = arith.constant 0 : i32
    %c0_i32_1 = arith.constant 0 : i32
    return %c0_i32, %c0_i32_0 : i32, i32
  }
  func.func @transform_2(%arg0: i32) -> (i32, i32) {
    %c0_i32 = arith.constant 0 : i32
    %c0_i32_0 = arith.constant 0 : i32
    %c0_i32_1 = arith.constant 0 : i32
    return %c0_i32, %c0_i32_0 : i32, i32
  }
  func.func @transform_3(%arg0: i32) -> (i32, i32) {
    %c0_i32 = arith.constant 0 : i32
    %c0_i32_0 = arith.constant 0 : i32
    %c0_i32_1 = arith.constant 0 : i32
    return %c0_i32, %c0_i32_0 : i32, i32
  }
  func.func @transform_4(%arg0: i32) -> (i32, i32) {
    %c0_i32 = arith.constant 0 : i32
    %c0_i32_0 = arith.constant 0 : i32
    %c0_i32_1 = arith.constant 0 : i32
    return %c0_i32, %c0_i32_0 : i32, i32
  }
  func.func @transform_5(%arg0: i32) -> (i32, i32, i32) {
    %c0_i32 = arith.constant 0 : i32
    %c0_i32_0 = arith.constant 0 : i32
    %c0_i32_1 = arith.constant 0 : i32
    return %c0_i32, %arg0, %c0_i32_0 : i32, i32, i32
  }
  func.func @transform_6(%arg0: i32) -> (i32, i32) {
    %c0_i32 = arith.constant 0 : i32
    %c0_i32_0 = arith.constant 0 : i32
    %c0_i32_1 = arith.constant 0 : i32
    return %c0_i32, %c0_i32_0 : i32, i32
  }
  func.func @transform_7(%arg0: i32) -> (i32, i32) {
    %c0_i32 = arith.constant 0 : i32
    %c0_i32_0 = arith.constant 0 : i32
    %c0_i32_1 = arith.constant 0 : i32
    return %c0_i32, %c0_i32_0 : i32, i32
  }
  func.func @transform_8(%arg0: i32) -> (i32, i32) {
    %c0_i32 = arith.constant 0 : i32
    %c0_i32_0 = arith.constant 0 : i32
    %c0_i32_1 = arith.constant 0 : i32
    return %c0_i32, %c0_i32_0 : i32, i32
  }
  func.func @transform_9(%arg0: i32) -> (i32, i32) {
    %c0_i32 = arith.constant 0 : i32
    %c0_i32_0 = arith.constant 0 : i32
    %c0_i32_1 = arith.constant 0 : i32
    return %c0_i32, %c0_i32_0 : i32, i32
  }
  func.func @transform_10(%arg0: i32) -> (i32, i32) {
    %c0_i32 = arith.constant 0 : i32
    %c0_i32_0 = arith.constant 0 : i32
    return %arg0, %c0_i32 : i32, i32
  }
  func.func @transform_11(%arg0: i32) -> (i32, i32, i32) {
    %c0_i32 = arith.constant 0 : i32
    %c0_i32_0 = arith.constant 0 : i32
    %c0_i32_1 = arith.constant 0 : i32
    return %c0_i32, %arg0, %c0_i32_0 : i32, i32, i32
  }
  func.func @transform_12(%arg0: i32) -> (i32, i32, i32) {
    %c0_i32 = arith.constant 0 : i32
    %c0_i32_0 = arith.constant 0 : i32
    %c0_i32_1 = arith.constant 0 : i32
    return %c0_i32, %arg0, %c0_i32_0 : i32, i32, i32
  }
}

</mosaic_0001>

<bundles_post_ra>
// kernel: vae_forward.1
= control target key start
LH: loop header
LB: loop body
LE: loop exit
PB: predicated region body
PF: predicated region fallthrough
CT: control target
= control target key end

     0   :  { %s1938_s21 = smov 0   ;;  %s1940_s22 = smov 0   ;;  %s2244_s0 = inlined_call_operand.vmem [shape: bf16[64,128], index: 0, kind: input, shape index: {}]   ;;  %s2245_s1 = inlined_call_operand.vmem [shape: bf16[128,128], index: 1, kind: input, shape index: {}]   ;;  %s2246_s2 = inlined_call_operand.vmem [shape: f32[1,128], index: 2, kind: input, shape index: {}]   ;;  %s2247_s3 = inlined_call_operand.vmem [shape: bf16[128,256], index: 3, kind: input, shape index: {}]   ;;  %s2248_s4 = inlined_call_operand.vmem [shape: f32[1,256], index: 4, kind: input, shape index: {}]   ;;  %s2249_s5 = inlined_call_operand.vmem [shape: f32[3,64,128], index: 5, kind: input, shape index: {}]   ;;  %s2250_s6 = inlined_call_operand.vmem [shape: bf16[128,128], index: 6, kind: input, shape index: {}]   ;;  %s2251_s7 = inlined_call_operand.vmem [shape: f32[1,128], index: 7, kind: input, shape index: {}]   ;;  %s2252_s8 = inlined_call_operand.vmem [shape: bf16[128,128], index: 8, kind: input, shape index: {}]   ;;  %s2253_s9 = inlined_call_operand.vmem [shape: f32[1,128], index: 9, kind: input, shape index: {}]   ;;  %s2254_s10 = inlined_call_operand.vmem [shape: f32[64,256], index: 10, kind: output, shape index: {0}]   ;;  %s2255_s11 = inlined_call_operand.vmem [shape: f32[3,64,128], index: 11, kind: output, shape index: {1}]   ;;  %s2256_s12 = inlined_call_operand.vmem [shape: f32[3,64,128], index: 12, kind: output, shape index: {2}]  }
   0x1   :  { %s1942_s23 = smov 0  }
   0x2 LB: > { %s1954_s24 = sadd.s32 4294967295, %s1870_s23   ;;  %s1957_s25 = sadd.s32 1, %s1870_s23   ;;  %s1870_s23 = sphi %s1942_s23, %s2260_s23   ;;  %s1866_s22 = sphi %s1940_s22, %s2259_s22   ;;  %s1862_s21 = sphi %s1938_s21, %s2258_s21  }
   0x3   : > { %s137_s26 = ssub.s32 %s1870_s23, %s1957_s25  ;;  %s140_s27 = sadd.s32 1, %s1866_s22 }
   0x4   : > { %p138_p0 = scmp.eq.s32.totalorder %s137_s26, 0  ;;  %p147_p1 = scmp.ne.s32.totalorder %s1866_s22, %s1862_s21 }
   0x5   : > { %p148_p2 = scmp.eq.s32.totalorder %s1870_s23, 0  ;;  %p287_p3 = scmp.eq.s32.totalorder %s1954_s24, 1 }
   0x6   : > { %s1967_s28 = scalar_select %p138_p0, %s1866_s22, %s140_s27  }
   0x7   : > { %p149_p4 = por %p148_p2, %p147_p1  ;;  %p1969_p5 = por %p287_p3, %p147_p1 }
   0x8   : > { %p1553_p6 = scmp.ge.s32.totalorder %s1870_s23, 2 }
   0xa   : > { %359 = sbr.rel (%p1553_p6) target bundleno = 28 (0x1c), region = 48 }
  0x11   : > { %371 = sbr.rel (!%p149_p4) target bundleno = 28 (0x1c), region = 56  ;;  %s373_s30 = sand.u32 (%p149_p4), 1, %s1866_s22  }
  0x12   : > { %s1613_s13 = sshll.u32 (%p149_p4), %s1870_s23, 5  ;;  %s1731_s14 = smul.u32 (%p149_p4), 96, %s373_s30 }
  0x13   : > { %s378_s17 = scalar_lea.vmem (%p149_p4), %s2249_s5, %s1613_s13 }
  0x14   : > { %v428_v0 = vld [vmem:[%s378_s17] sm:$0xff] (%p149_p4)  ;;  %v430_v1 = vld [vmem:[%s378_s17 + $0x8] sm:$0xff] (%p149_p4)  ;;  %v432_v2 = vld [vmem:[%s378_s17 + $0x10] sm:$0xff] (%p149_p4)  ;;  %s375_s18 = scalar_lea.vmem (%p149_p4), [#allocation2], %s1731_s14 }
  0x15   : > { %v434_v3 = vld [vmem:[%s378_s17 + $0x18] sm:$0xff] (%p149_p4)  ;;  %v436_v4 = vld [vmem:[%s378_s17 + $0x40] sm:$0xff] (%p149_p4)  ;;  %v438_v5 = vld [vmem:[%s378_s17 + $0x48] sm:$0xff] (%p149_p4)  ;;  %429 = vst [vmem:[%s375_s18] sm:$0xff] (%p149_p4), %v428_v0 }
  0x16   : > { %431 = vst [vmem:[%s375_s18 + $0x8] sm:$0xff] (%p149_p4), %v430_v1  ;;  %433 = vst [vmem:[%s375_s18 + $0x10] sm:$0xff] (%p149_p4), %v432_v2  ;;  %v440_v6 = vld [vmem:[%s378_s17 + $0x50] sm:$0xff] (%p149_p4)  ;;  %v442_v7 = vld [vmem:[%s378_s17 + $0x58] sm:$0xff] (%p149_p4) }
  0x17   : > { %435 = vst [vmem:[%s375_s18 + $0x18] sm:$0xff] (%p149_p4), %v434_v3  ;;  %437 = vst [vmem:[%s375_s18 + $0x20] sm:$0xff] (%p149_p4), %v436_v4  ;;  %v444_v8 = vld [vmem:[%s378_s17 + $0x80] sm:$0xff] (%p149_p4)  ;;  %v446_v9 = vld [vmem:[%s378_s17 + $0x88] sm:$0xff] (%p149_p4) }
  0x18   : > { %439 = vst [vmem:[%s375_s18 + $0x28] sm:$0xff] %v438_v5  ;;  %441 = vst [vmem:[%s375_s18 + $0x30] sm:$0xff] %v440_v6  ;;  %v448_v10 = vld [vmem:[%s378_s17 + $0x90] sm:$0xff]  ;;  %v450_v11 = vld [vmem:[%s378_s17 + $0x98] sm:$0xff] }
  0x19   : > { %443 = vst [vmem:[%s375_s18 + $0x38] sm:$0xff] %v442_v7  ;;  %445 = vst [vmem:[%s375_s18 + $0x40] sm:$0xff] %v444_v8 }
  0x1a   : > { %447 = vst [vmem:[%s375_s18 + $0x48] sm:$0xff] %v446_v9  ;;  %449 = vst [vmem:[%s375_s18 + $0x50] sm:$0xff] %v448_v10 }
  0x1b   : > { %451 = vst [vmem:[%s375_s18 + $0x58] sm:$0xff] %v450_v11 }
  0x1c PF: > { %p1556_p7 = scmp.ge.s32.totalorder %s1870_s23, 1  ;;  %p456_p8 = scmp.lt.s32.totalorder %s1870_s23, 3 }
  0x1e   : > { %p457_p9 = pnand %p1556_p7, %p456_p8 }
  0x1f   : > { %v1758_v12 = vld [vmem:[%s2245_s1] sm:$0xff] (!%p457_p9)   ;;  %s1557_s26 = sshll.u32 (!%p457_p9), %s1954_s24, 2  ;;  %v1759_v13 = vld [vmem:[%s2245_s1 + $0x8] sm:$0xff] (!%p457_p9)   ;;  %v1760_v14 = vld [vmem:[%s2245_s1 + $0x10] sm:$0xff] (!%p457_p9)   ;;  %v1872_v36 = vmov (!%p457_p9), 0   ;;  %v695_v1 = vlaneseq (!%p457_p9) }
  0x20   : > { %460 = sbr.rel (%p457_p9) target bundleno = 1013 (0x3f5), region = 94  ;;  %p519_p10 = scmp.lt.s32.totalorder (!%p457_p9), %s1557_s26, 7  ;;  %1655 = vmatprep.subr.bf16.mxu0 (!%p457_p9), %v1758_v12  ;;  %v1761_v15 = vld [vmem:[%s2245_s1 + $0x18] sm:$0xff] (!%p457_p9)   ;;  %v1768_v17 = vld [vmem:[%s2247_s3 + $0x4] ss:$8 sps:$4 sm:$0xff] (!%p457_p9)   ;;  %v1764_v26 = vld [vmem:[%s2245_s1 + $0x30] sm:$0xff] (!%p457_p9)   ;;  %817 = vmatprep.mubr.bf16.mxu1 (!%p457_p9), %v1872_v36 }
  0x21   : > { %1656 = vmatpush3.bf16.msra.mxu0 (!%p457_p9), %v1758_v12  ;;  %v1770_v18 = vld [vmem:[%s2247_s3] ss:$8 sps:$4 sm:$0xff] (!%p457_p9)   ;;  %785 = vmatprep.subr.bf16.mxu1 (!%p457_p9), %v1768_v17  ;;  %v1771_v20 = vld [vmem:[%s2247_s3 + $0x14] ss:$8 sps:$4 sm:$0xff] (!%p457_p9)   ;;  %v1773_v21 = vld [vmem:[%s2247_s3 + $0x10] ss:$8 sps:$4 sm:$0xff] (!%p457_p9)  }
  0x22   : > { %1657 = vmatprep.subr.bf16.mxu0 (!%p457_p9), %v1759_v13  ;;  %v1762_v19 = vld [vmem:[%s2245_s1 + $0x20] sm:$0xff] (!%p457_p9)   ;;  %786 = vmatpush1.bf16.msra.mxu1 (!%p457_p9), %v1770_v18  ;;  %v1763_v22 = vld [vmem:[%s2245_s1 + $0x28] sm:$0xff] (!%p457_p9)   ;;  %v1777_v25 = vld [vmem:[%s2247_s3 + $0x34] ss:$8 sps:$4 sm:$0xff] (!%p457_p9)   ;;  %v696_v2 = vshrl.u32 (!%p457_p9), %v695_v1, 7 }
  0x23   : > { %787 = vmatprep.subr.bf16.mxu1 (!%p457_p9), %v1771_v20  ;;  %v1774_v23 = vld [vmem:[%s2247_s3 + $0x24] ss:$8 sps:$4 sm:$0xff] (!%p457_p9)   ;;  %v1776_v24 = vld [vmem:[%s2247_s3 + $0x20] ss:$8 sps:$4 sm:$0xff] (!%p457_p9)   ;;  %v1765_v27 = vld [vmem:[%s2245_s1 + $0x38] sm:$0xff] (!%p457_p9)  }
  0x24   : > { %v1779_v29 = vld [vmem:[%s2247_s3 + $0x30] ss:$8 sps:$4 sm:$0xff] (!%p457_p9)   ;;  %v1780_v30 = vld [vmem:[%s2247_s3 + $0x44] ss:$8 sps:$4 sm:$0xff] (!%p457_p9)   ;;  %v1782_v31 = vld [vmem:[%s2247_s3 + $0x40] ss:$8 sps:$4 sm:$0xff] (!%p457_p9)  }
  0x25   : > { %1658 = vmatpush3.bf16.msra.mxu0 (!%p457_p9), %v1759_v13  ;;  %v1783_v32 = vld [vmem:[%s2247_s3 + $0x54] ss:$8 sps:$4 sm:$0xff] (!%p457_p9)   ;;  %v1785_v33 = vld [vmem:[%s2247_s3 + $0x50] ss:$8 sps:$4 sm:$0xff] (!%p457_p9)   ;;  %v1786_v34 = vld [vmem:[%s2247_s3 + $0x64] ss:$8 sps:$4 sm:$0xff] (!%p457_p9)  }
  0x26   : > { %1659 = vmatprep.subr.bf16.mxu0 (!%p457_p9), %v1760_v14  ;;  %788 = vmatpush1.bf16.msra.mxu1 (!%p457_p9), %v1773_v21  ;;  %v1788_v35 = vld [vmem:[%s2247_s3 + $0x60] ss:$8 sps:$4 sm:$0xff] (!%p457_p9)   ;;  %v1789_v37 = vld [vmem:[%s2247_s3 + $0x74] ss:$8 sps:$4 sm:$0xff] (!%p457_p9)   ;;  %v1791_v38 = vld [vmem:[%s2247_s3 + $0x70] ss:$8 sps:$4 sm:$0xff] (!%p457_p9)  }
  0x27   : > { %s2262_s26 = smov (!%p519_p10, %s1557_s26), 7  ;;  %789 = vmatprep.subr.bf16.mxu1 %v1774_v23  ;;  %v1562_v39 = vld [vmem:[%s2246_s2] ss:$0 sm:$0xff]  ;;  %v1793_v55 = vld [vmem:[%s2250_s6 + $0x8] sm:$0xff]   ;;  %v1794_v56 = vld [vmem:[%s2250_s6 + $0x10] sm:$0xff]   ;;  %v697_v3 = vsub.s32 0, %v696_v2 }
  0x28   : > { %s1558_s14 = sshll.u32 %s2262_s26, 2  ;;  %v1792_v54 = vld [vmem:[%s2250_s6] sm:$0xff]   ;;  %v1795_v57 = vld [vmem:[%s2250_s6 + $0x18] sm:$0xff]   ;;  %v1797_v59 = vld [vmem:[%s2250_s6 + $0x28] sm:$0xff]   ;;  %v701_v5 = vsub.s32 1, %v696_v2  ;;  %s1614_s30 = sshll.u32 %s2262_s26, 4 }
  0x29   : > { %s1997_s17 = scalar_lea.vmem %s2244_s0, %s1558_s14  ;;  %1660 = vmatpush3.bf16.msra.mxu0 %v1760_v14  ;;  %v1796_v58 = vld [vmem:[%s2250_s6 + $0x20] sm:$0xff]   ;;  %v1798_v60 = vld [vmem:[%s2250_s6 + $0x30] sm:$0xff]   ;;  %v1799_v61 = vld [vmem:[%s2250_s6 + $0x38] sm:$0xff]   ;;  %s2107_s14 = scalar_lea.vmem %s2254_s10, %s1614_s30 }
  0x2a   : > { %v1766_v16 = vld [vmem:[%s1997_s17] sm:$0xff]   ;;  %1661 = vmatprep.subr.bf16.mxu0 %v1761_v15  ;;  %790 = vmatpush1.bf16.msra.mxu1 %v1776_v24  ;;  %v1767_v28 = vld [vmem:[%s1997_s17 + $0x8] sm:$0xff]   ;;  %v1802_v0 = vld [vmem:[%s2252_s8 + $0x10] sm:$0xff]   ;;  %s463_s26 = sand.u32 1, %s1862_s21  }
  0x2b   : > { %1671 = vmatprep.mubr.bf16.mxu0 %v1766_v16  ;;  %791 = vmatprep.subr.bf16.mxu1 %v1777_v25  ;;  %v1800_v62 = vld [vmem:[%s2252_s8] sm:$0xff]   ;;  %v1801_v63 = vld [vmem:[%s2252_s8 + $0x8] sm:$0xff]   ;;  %s2116_s15 = smul.u32 96, %s463_s26 }
  0x2c   : > { %v693_v4 = vld [vmem:[%s2248_s4] sm:$0x3] }
  0x2d   : > { %1662 = vmatpush3.bf16.msra.mxu0 %v1761_v15  ;;  %v698_v6 = vrot.slane %v693_v4, %v697_v3  ;;  %v702_v7 = vrot.slane %v693_v4, %v701_v5  ;;  %s2127_s21 = scalar_lea.vmem [#allocation2], %s2116_s15  ;;  %s2136_s16 = scalar_lea.vmem [#allocation3], %s2116_s15 }
  0x2e   : > { %1663 = vmatprep.subr.bf16.mxu0 %v1762_v19  ;;  %792 = vmatpush1.bf16.msra.mxu1 %v1779_v29  ;;  %s2184_s20 = scalar_lea.vmem [#allocation4], %s2116_s15  ;;  %s1615_s15 = sshll.u32 (%p1969_p5), %s1954_s24, 5 }
  0x2f   : > { %793 = vmatprep.subr.bf16.mxu1 %v1780_v30  ;;  %s1269_s23 = scalar_lea.vmem (%p1969_p5), %s2255_s11, %s1615_s15 }
  0x31   : > { %1664 = vmatpush3.bf16.msra.mxu0 %v1762_v19 }
  0x32   : > { %1665 = vmatprep.subr.bf16.mxu0 %v1763_v22  ;;  %794 = vmatpush1.bf16.msra.mxu1 %v1782_v31 }
  0x33   : > { %795 = vmatprep.subr.bf16.mxu1 %v1783_v32  ;;  %v858_v32 = vld [vmem:[%s2127_s21] sm:$0xff] }
  0x35   : > { %1666 = vmatpush3.bf16.msra.mxu0 %v1763_v22 }
  0x36   : > { %1667 = vmatprep.subr.bf16.mxu0 %v1764_v26  ;;  %796 = vmatpush1.bf16.msra.mxu1 %v1785_v33  ;;  %v862_v33 = vld [vmem:[%s2127_s21 + $0x20] sm:$0xff] }
  0x37   : > { %797 = vmatprep.subr.bf16.mxu1 %v1786_v34  ;;  %v866_v34 = vld [vmem:[%s2127_s21 + $0x40] sm:$0xff] }
  0x39   : > { %1668 = vmatpush3.bf16.msra.mxu0 %v1764_v26 }
  0x3a   : > { %1669 = vmatprep.subr.bf16.mxu0 %v1765_v27  ;;  %798 = vmatpush1.bf16.msra.mxu1 %v1788_v35 }
  0x3b   : > { %799 = vmatprep.subr.bf16.mxu1 %v1789_v37  ;;  %v863_v37 = vld [vmem:[%s2127_s21 + $0x28] sm:$0xff] }
  0x3d   : > { %1670 = vmatpush3.bf16.msra.mxu0 %v1765_v27 }
  0x3e   : > { %800 = vmatpush1.bf16.msra.mxu1 %v1791_v38  ;;  %1675 = vmatprep.subr.bf16.mxu0 %v1792_v54 }
  0x3f   : > { %1703 = vmatprep.subr.bf16.mxu1 %v1800_v62 }
  0x40   : > { %1672 = vmatmul.mubr.bf16.vlgmr.msra.gmra.mrb[0].mxu0 %v1767_v28 }
  0x41   : > { %1676 = vmatpush3.bf16.msra.mxu0 %v1792_v54  ;;  %v868_v54 = vld [vmem:[%s2127_s21 + $0x50] sm:$0xff] }
  0x42   : > { %1677 = vmatprep.subr.bf16.mxu0 %v1793_v55 }
  0x45   : > { %1678 = vmatpush3.bf16.msra.mxu0 %v1793_v55 }
  0x46   : > { %1679 = vmatprep.subr.bf16.mxu0 %v1794_v56 }
  0x49   : > { %1680 = vmatpush3.bf16.msra.mxu0 %v1794_v56 }
  0x4a   : > { %1681 = vmatprep.subr.bf16.mxu0 %v1795_v57 }
  0x4d   : > { %1682 = vmatpush3.bf16.msra.mxu0 %v1795_v57 }
  0x4e   : > { %1683 = vmatprep.subr.bf16.mxu0 %v1796_v58 }
  0x51   : > { %1684 = vmatpush3.bf16.msra.mxu0 %v1796_v58  ;;  %v861_v58 = vld [vmem:[%s2127_s21 + $0x18] sm:$0xff] }
  0x52   : > { %1685 = vmatprep.subr.bf16.mxu0 %v1797_v59 }
  0x55   : > { %1686 = vmatpush3.bf16.msra.mxu0 %v1797_v59  ;;  %v865_v59 = vld [vmem:[%s2127_s21 + $0x38] sm:$0xff] }
  0x56   : > { %1687 = vmatprep.subr.bf16.mxu0 %v1798_v60 }
  0x59   : > { %1688 = vmatpush3.bf16.msra.mxu0 %v1798_v60 }
  0x5a   : > { %1689 = vmatprep.subr.bf16.mxu0 %v1799_v61 }
  0x5d   : > { %1690 = vmatpush3.bf16.msra.mxu0 %v1799_v61 }
 0x113   : > { %v1673_v40 = vpop.f32.mrb[0].mxu0 }
 0x114   : > { %v665_v41 = vadd.f32 %v1673_v40, %v1562_v39  ;;  %v656_v42 = vpop.f32.mrb[1].mxu0  ;;  %v867_v40 = vld [vmem:[%s2127_s21 + $0x48] sm:$0xff] }
 0x115   : > { %v657_v43 = vadd.f32 %v1562_v39, %v656_v42  ;;  %v1674_v44 = vpop.f32.mrb[2].mxu0 }
 0x116   : > { %1808 = vtanh.f32 %v665_v41  ;;  %v668_v45 = vadd.f32 %v1674_v44, %v1562_v39  ;;  %v659_v46 = vpop.f32.mrb[3].mxu0 }
 0x117   : > { %1810 = vtanh.f32 %v657_v43  ;;  %v660_v47 = vadd.f32 %v1562_v39, %v659_v46 }
 0x118   : > { %1812 = vtanh.f32 %v668_v45 }
 0x119   : > { %1814 = vtanh.f32 %v660_v47 }
 0x120   : > { %v1809_v48 = vpop.eup %1808 }
 0x121   : > { %v1811_v49 = vpop.eup %1810 }
 0x122   : > { %v1813_v50 = vpop.eup %1812 }
 0x123   : > { %v1815_v51 = vpop.eup %1814  ;;  %v676_v52 = vpack.c.bf16 %v1813_v50, %v1809_v48 }
 0x124   : > { %v675_v53 = vpack.c.bf16 %v1815_v51, %v1811_v49  ;;  %v860_v51 = vld [vmem:[%s2127_s21 + $0x10] sm:$0xff] }
 0x126   : > { %818 = vmatmul.mubr.bf16.vlgmr.msra.gmra.mrb[0].mxu1 %v675_v53 }
 0x127   : > { %827 = vmatprep.mubr.bf16.mxu1 %v1872_v36  ;;  %1704 = vmatpush3.bf16.msra.mxu1 %v1800_v62  ;;  %v859_v36 = vld [vmem:[%s2127_s21 + $0x8] sm:$0xff] }
 0x128   : > { %1705 = vmatprep.subr.bf16.mxu1 %v1801_v63 }
 0x12b   : > { %1706 = vmatpush3.bf16.msra.mxu1 %v1801_v63  ;;  %v869_v63 = vld [vmem:[%s2127_s21 + $0x58] sm:$0xff] }
 0x12c   : > { %1707 = vmatprep.subr.bf16.mxu1 %v1802_v0 }
 0x12e   : > { %828 = vmatmul.mubr.bf16.gmra.mrb[4].mxu1 %v676_v52  ;;  %v864_v52 = vld [vmem:[%s2127_s21 + $0x30] sm:$0xff] }
 0x12f   : > { %1708 = vmatpush3.bf16.msra.mxu1 %v1802_v0 }
 0x1f9   : > { %v819_v8 = vpop.f32.mrb[0].mxu1 }
 0x1fa   : > { %v820_v9 = vadd.f32 %v819_v8, %v698_v6  ;;  %v821_v10 = vpop.f32.mrb[1].mxu1 }
 0x1fb   : > { %v822_v11 = vadd.f32 %v821_v10, %v702_v7  ;;  %v823_v12 = vpop.f32.mrb[2].mxu1 }
 0x1fc   : > { %838 = vst [vmem:[%s2107_s14] sm:$0xff] %v820_v9  ;;  %v824_v13 = vadd.f32 %v823_v12, %v698_v6  ;;  %v825_v14 = vpop.f32.mrb[3].mxu1 }
 0x1fd   : > { %839 = vst [vmem:[%s2107_s14 + $0x8] sm:$0xff] %v822_v11  ;;  %v846_v15 = vmul.f32 0.5, %v822_v11  ;;  %v826_v16 = vadd.f32 %v825_v14, %v702_v7  ;;  %v1803_v14 = vld [vmem:[%s2252_s8 + $0x18] sm:$0xff]  }
 0x1fe   : > { %840 = vst [vmem:[%s2107_s14 + $0x10] sm:$0xff] %v824_v13  ;;  %1709 = vmatprep.subr.bf16.mxu1 %v1803_v14 }
 0x1ff   : > { %v850_v17 = vmul.f32 1.442695, %v846_v15  ;;  %841 = vst [vmem:[%s2107_s14 + $0x18] sm:$0xff] %v826_v16  ;;  %v847_v18 = vmul.f32 0.5, %v826_v16  ;;  %1710 = vmatpush3.bf16.msra.mxu1 %v1803_v14  ;;  %v1804_v15 = vld [vmem:[%s2252_s8 + $0x20] sm:$0xff]   ;;  %v1805_v16 = vld [vmem:[%s2252_s8 + $0x28] sm:$0xff]  }
 0x200   : > { %1711 = vmatprep.subr.bf16.mxu1 %v1804_v15 }
 0x201   : > { %1816 = vpow2.f32 %v850_v17  ;;  %v852_v19 = vmul.f32 1.442695, %v847_v18  ;;  %v829_v20 = vpop.f32.mrb[4].mxu1  ;;  %v1806_v17 = vld [vmem:[%s2252_s8 + $0x30] sm:$0xff]   ;;  %v1807_v18 = vld [vmem:[%s2252_s8 + $0x38] sm:$0xff]  }
 0x202   : > { %v2114_v21 = vadd.f32 %v829_v20, %v698_v6  ;;  %v831_v22 = vpop.f32.mrb[5].mxu1 }
 0x203   : > { %1818 = vpow2.f32 %v852_v19  ;;  %v832_v23 = vadd.f32 %v831_v22, %v702_v7  ;;  %v833_v24 = vpop.f32.mrb[6].mxu1  ;;  %1712 = vmatpush3.bf16.msra.mxu1 %v1804_v15  ;;  %v1589_v19 = vld [vmem:[%s2251_s7] ss:$0 sm:$0xff] }
 0x204   : > { %842 = vst [vmem:[%s2107_s14 + $0x20] sm:$0xff] %v2114_v21  ;;  %v2120_v25 = vadd.f32 %v833_v24, %v698_v6  ;;  %v835_v26 = vpop.f32.mrb[7].mxu1  ;;  %1713 = vmatprep.subr.bf16.mxu1 %v1805_v16 }
 0x205   : > { %843 = vst [vmem:[%s2107_s14 + $0x28] sm:$0xff] %v832_v23  ;;  %v848_v27 = vmul.f32 0.5, %v832_v23  ;;  %v836_v28 = vadd.f32 %v835_v26, %v702_v7 }
 0x206   : > { %844 = vst [vmem:[%s2107_s14 + $0x30] sm:$0xff] %v2120_v25 }
 0x207   : > { %v854_v29 = vmul.f32 1.442695, %v848_v27  ;;  %845 = vst [vmem:[%s2107_s14 + $0x38] sm:$0xff] %v836_v28  ;;  %v849_v30 = vmul.f32 0.5, %v836_v28  ;;  %1714 = vmatpush3.bf16.msra.mxu1 %v1805_v16 }
 0x208   : > { %1715 = vmatprep.subr.bf16.mxu1 %v1806_v17 }
 0x209   : > { %1820 = vpow2.f32 %v854_v29  ;;  %v856_v31 = vmul.f32 1.442695, %v849_v30 }
 0x20b   : > { %v1817_v35 = vpop.eup %1816  ;;  %1822 = vpow2.f32 %v856_v31  ;;  %1716 = vmatpush3.bf16.msra.mxu1 %v1806_v17 }
 0x20c   : > { %v870_v38 = vmul.f32 %v1817_v35, %v858_v32  ;;  %v874_v39 = vmul.f32 %v1817_v35, %v862_v33  ;;  %v878_v41 = vmul.f32 %v1817_v35, %v866_v34  ;;  %1717 = vmatprep.subr.bf16.mxu1 %v1807_v18 }
 0x20d   : > { %v1819_v42 = vpop.eup %1818 }
 0x20e   : > { %v871_v43 = vmul.f32 %v1819_v42, %v859_v36  ;;  %v882_v44 = vadd.f32 %v870_v38, %v820_v9  ;;  %v875_v45 = vmul.f32 %v1819_v42, %v863_v37  ;;  %v886_v46 = vadd.f32 %v874_v39, %v820_v9 }
 0x20f   : > { %v879_v47 = vmul.f32 %v1819_v42, %v867_v40  ;;  %v890_v48 = vadd.f32 %v878_v41, %v820_v9  ;;  %1718 = vmatpush3.bf16.msra.mxu1 %v1807_v18 }
 0x210   : > { %v883_v49 = vadd.f32 %v871_v43, %v824_v13  ;;  %894 = vst [vmem:[%s2136_s16] sm:$0xff] %v882_v44  ;;  %v887_v50 = vadd.f32 %v875_v45, %v824_v13  ;;  %898 = vst [vmem:[%s2136_s16 + $0x20] sm:$0xff] %v886_v46 }
 0x211   : > { %v891_v53 = vadd.f32 %v879_v47, %v824_v13  ;;  %902 = vst [vmem:[%s2136_s16 + $0x40] sm:$0xff] %v890_v48 }
 0x212   : > { %895 = vst [vmem:[%s2136_s16 + $0x8] sm:$0xff] %v883_v49  ;;  %v906_v55 = vpack.c.bf16 %v883_v49, %v882_v44  ;;  %899 = vst [vmem:[%s2136_s16 + $0x28] sm:$0xff] %v887_v50  ;;  %v908_v56 = vpack.c.bf16 %v887_v50, %v886_v46 }
 0x213   : > { %v1821_v57 = vpop.eup %1820  ;;  %903 = vst [vmem:[%s2136_s16 + $0x48] sm:$0xff] %v891_v53  ;;  %v910_v60 = vpack.c.bf16 %v891_v53, %v890_v48 }
 0x214   : > { %1691 = vmatprep.mubr.bf16.mxu0 %v906_v55  ;;  %v872_v61 = vmul.f32 %v1821_v57, %v860_v51  ;;  %v876_v62 = vmul.f32 %v1821_v57, %v864_v52  ;;  %v880_v0 = vmul.f32 %v1821_v57, %v868_v54 }
 0x215   : > { %v1823_v1 = vpop.eup %1822 }
 0x216   : > { %v873_v2 = vmul.f32 %v1823_v1, %v861_v58  ;;  %v884_v3 = vadd.f32 %v872_v61, %v2114_v21  ;;  %v877_v4 = vmul.f32 %v1823_v1, %v865_v59  ;;  %v888_v5 = vadd.f32 %v876_v62, %v2114_v21  ;;  %v1598_v62 = vld [vmem:[%s2253_s9] ss:$0 sm:$0xff] }
 0x217   : > { %v881_v6 = vmul.f32 %v1823_v1, %v869_v63  ;;  %v892_v7 = vadd.f32 %v880_v0, %v2114_v21 }
 0x218   : > { %v885_v8 = vadd.f32 %v873_v2, %v2120_v25  ;;  %896 = vst [vmem:[%s2136_s16 + $0x10] sm:$0xff] %v884_v3  ;;  %v889_v9 = vadd.f32 %v877_v4, %v2120_v25  ;;  %900 = vst [vmem:[%s2136_s16 + $0x30] sm:$0xff] %v888_v5 }
 0x219   : > { %v893_v10 = vadd.f32 %v881_v6, %v2120_v25  ;;  %904 = vst [vmem:[%s2136_s16 + $0x50] sm:$0xff] %v892_v7 }
 0x21a   : > { %897 = vst [vmem:[%s2136_s16 + $0x18] sm:$0xff] %v885_v8  ;;  %v907_v11 = vpack.c.bf16 %v885_v8, %v884_v3  ;;  %901 = vst [vmem:[%s2136_s16 + $0x38] sm:$0xff] %v889_v9  ;;  %v909_v12 = vpack.c.bf16 %v889_v9, %v888_v5 }
 0x21b   : > { %905 = vst [vmem:[%s2136_s16 + $0x58] sm:$0xff] %v893_v10  ;;  %v911_v13 = vpack.c.bf16 %v893_v10, %v892_v7 }
 0x21c   : > { %1692 = vmatmul.mubr.bf16.vlgmr.msra.gmra.mrb[4].mxu0 %v907_v11 }
 0x21d   : > { %1695 = vmatprep.mubr.bf16.mxu0 %v908_v56 }
 0x224   : > { %1696 = vmatmul.mubr.bf16.gmra.mrb[8].mxu0 %v909_v12 }
 0x225   : > { %1699 = vmatprep.mubr.bf16.mxu0 %v910_v60 }
 0x22c   : > { %1700 = vmatmul.mubr.bf16.gmra.mrb[12].mxu0 %v911_v13 }
 0x2ef   : > { %v1693_v20 = vpop.f32.mrb[4].mxu0 }
 0x2f0   : > { %v1026_v21 = vadd.f32 %v1693_v20, %v1589_v19  ;;  %v1017_v22 = vpop.f32.mrb[5].mxu0 }
 0x2f1   : > { %v1018_v23 = vadd.f32 %v1589_v19, %v1017_v22  ;;  %v1694_v24 = vpop.f32.mrb[6].mxu0 }
 0x2f2   : > { %1824 = vtanh.f32 %v1026_v21  ;;  %v1029_v25 = vadd.f32 %v1694_v24, %v1589_v19  ;;  %v1020_v26 = vpop.f32.mrb[7].mxu0  ;;  %v1321_v24 = vld [vmem:[%s2136_s16 + $0x8] sm:$0xff] (%p1969_p5) }
 0x2f3   : > { %1826 = vtanh.f32 %v1018_v23  ;;  %v1021_v27 = vadd.f32 %v1589_v19, %v1020_v26  ;;  %v1319_v23 = vld [vmem:[%s2136_s16] sm:$0xff] (%p1969_p5)  ;;  %v1325_v26 = vld [vmem:[%s2136_s16 + $0x18] sm:$0xff] (%p1969_p5)  ;;  %1322 = vst [vmem:[%s1269_s23 + $0x8] sm:$0xff] (%p1969_p5), %v1321_v24 }
 0x2f4   : > { %1828 = vtanh.f32 %v1029_v25  ;;  %v1323_v25 = vld [vmem:[%s2136_s16 + $0x10] sm:$0xff] (%p1969_p5)  ;;  %1320 = vst [vmem:[%s1269_s23] sm:$0xff] (%p1969_p5), %v1319_v23  ;;  %1326 = vst [vmem:[%s1269_s23 + $0x18] sm:$0xff] (%p1969_p5), %v1325_v26 }
 0x2f5   : > { %1830 = vtanh.f32 %v1021_v27  ;;  %v1327_v27 = vld [vmem:[%s2136_s16 + $0x20] sm:$0xff] (%p1969_p5)  ;;  %1324 = vst [vmem:[%s1269_s23 + $0x10] sm:$0xff] (%p1969_p5), %v1323_v25 }
 0x2f6   : > { %1328 = vst [vmem:[%s1269_s23 + $0x40] sm:$0xff] (%p1969_p5), %v1327_v27 }
 0x2f7   : > { %v1697_v28 = vpop.f32.mrb[8].mxu0 }
 0x2f8   : > { %v1042_v29 = vadd.f32 %v1697_v28, %v1589_v19  ;;  %v1033_v30 = vpop.f32.mrb[9].mxu0  ;;  %v1329_v28 = vld [vmem:[%s2136_s16 + $0x28] sm:$0xff] (%p1969_p5) }
 0x2f9   : > { %v1034_v31 = vadd.f32 %v1589_v19, %v1033_v30  ;;  %v1698_v32 = vpop.f32.mrb[10].mxu0  ;;  %1330 = vst [vmem:[%s1269_s23 + $0x48] sm:$0xff] (%p1969_p5), %v1329_v28  ;;  %v1333_v30 = vld [vmem:[%s2136_s16 + $0x38] sm:$0xff] (%p1969_p5) }
 0x2fa   : > { %1832 = vtanh.f32 %v1042_v29  ;;  %v1045_v33 = vadd.f32 %v1698_v32, %v1589_v19  ;;  %v1036_v34 = vpop.f32.mrb[11].mxu0  ;;  %v1331_v29 = vld [vmem:[%s2136_s16 + $0x30] sm:$0xff] (%p1969_p5)  ;;  %1334 = vst [vmem:[%s1269_s23 + $0x58] sm:$0xff] (%p1969_p5), %v1333_v30  ;;  %v1337_v32 = vld [vmem:[%s2136_s16 + $0x48] sm:$0xff] (%p1969_p5) }
 0x2fb   : > { %1834 = vtanh.f32 %v1034_v31  ;;  %v1037_v35 = vadd.f32 %v1589_v19, %v1036_v34  ;;  %v1335_v31 = vld [vmem:[%s2136_s16 + $0x40] sm:$0xff] (%p1969_p5)  ;;  %1332 = vst [vmem:[%s1269_s23 + $0x50] sm:$0xff] (%p1969_p5), %v1331_v29  ;;  %v1341_v34 = vld [vmem:[%s2136_s16 + $0x58] sm:$0xff] (%p1969_p5)  ;;  %1338 = vst [vmem:[%s1269_s23 + $0x88] sm:$0xff] (%p1969_p5), %v1337_v32 }
 0x2fc   : > { %v1825_v36 = vpop.eup %1824  ;;  %1836 = vtanh.f32 %v1045_v33  ;;  %1336 = vst [vmem:[%s1269_s23 + $0x80] sm:$0xff] (%p1969_p5), %v1335_v31  ;;  %v1339_v33 = vld [vmem:[%s2136_s16 + $0x50] sm:$0xff] (%p1969_p5)  ;;  %1342 = vst [vmem:[%s1269_s23 + $0x98] sm:$0xff] (%p1969_p5), %v1341_v34 }
 0x2fd   : > { %v1827_v37 = vpop.eup %1826  ;;  %1838 = vtanh.f32 %v1037_v35  ;;  %1340 = vst [vmem:[%s1269_s23 + $0x90] sm:$0xff] (%p1969_p5), %v1339_v33 }
 0x2fe   : > { %v1829_v38 = vpop.eup %1828 }
 0x2ff   : > { %v1831_v39 = vpop.eup %1830  ;;  %v1701_v40 = vpop.f32.mrb[12].mxu0  ;;  %v1077_v41 = vpack.c.bf16 %v1829_v38, %v1825_v36 }
 0x300   : > { %v1058_v42 = vadd.f32 %v1701_v40, %v1589_v19  ;;  %v1049_v43 = vpop.f32.mrb[13].mxu0  ;;  %v1076_v44 = vpack.c.bf16 %v1831_v39, %v1827_v37 }
 0x301   : > { %v1050_v45 = vadd.f32 %v1589_v19, %v1049_v43  ;;  %v1702_v46 = vpop.f32.mrb[14].mxu0 }
 0x302   : > { %1840 = vtanh.f32 %v1058_v42  ;;  %v1061_v47 = vadd.f32 %v1702_v46, %v1589_v19  ;;  %v1052_v48 = vpop.f32.mrb[15].mxu0  ;;  %1719 = vmatprep.mubr.bf16.mxu1 %v1076_v44 }
 0x303   : > { %1842 = vtanh.f32 %v1050_v45  ;;  %v1053_v49 = vadd.f32 %v1589_v19, %v1052_v48  ;;  %1720 = vmatmul.mubr.bf16.vlgmr.msra.gmra.mrb[8].mxu1 %v1077_v41 }
 0x304   : > { %v1833_v50 = vpop.eup %1832  ;;  %1844 = vtanh.f32 %v1061_v47 }
 0x305   : > { %v1835_v51 = vpop.eup %1834  ;;  %1846 = vtanh.f32 %v1053_v49 }
 0x306   : > { %v1837_v52 = vpop.eup %1836 }
 0x307   : > { %v1839_v53 = vpop.eup %1838  ;;  %v1079_v54 = vpack.c.bf16 %v1837_v52, %v1833_v50 }
 0x308   : > { %v1078_v55 = vpack.c.bf16 %v1839_v53, %v1835_v51 }
 0x30a   : > { %1723 = vmatprep.mubr.bf16.mxu1 %v1078_v55 }
 0x30b   : > { %1724 = vmatmul.mubr.bf16.gmra.mrb[12].mxu1 %v1079_v54 }
 0x30c   : > { %v1841_v56 = vpop.eup %1840 }
 0x30d   : > { %v1843_v57 = vpop.eup %1842 }
 0x30e   : > { %v1845_v58 = vpop.eup %1844 }
 0x30f   : > { %v1847_v59 = vpop.eup %1846  ;;  %v1081_v60 = vpack.c.bf16 %v1845_v58, %v1841_v56 }
 0x310   : > { %v1080_v61 = vpack.c.bf16 %v1847_v59, %v1843_v57 }
 0x312   : > { %1727 = vmatprep.mubr.bf16.mxu1 %v1080_v61 }
 0x313   : > { %1728 = vmatmul.mubr.bf16.gmra.mrb[16].mxu1 %v1081_v60 }
 0x3d6   : > { %v1721_v63 = vpop.f32.mrb[8].mxu1 }
 0x3d7   : > { %v1196_v0 = vadd.f32 %v1721_v63, %v1598_v62  ;;  %v1187_v1 = vpop.f32.mrb[9].mxu1 }
 0x3d8   : > { %v1188_v2 = vadd.f32 %v1598_v62, %v1187_v1  ;;  %v1722_v3 = vpop.f32.mrb[10].mxu1 }
 0x3d9   : > { %1236 = vst [vmem:[%s2184_s20 + $0x10] sm:$0xff] %v1196_v0  ;;  %v1199_v4 = vadd.f32 %v1722_v3, %v1598_v62  ;;  %v1190_v5 = vpop.f32.mrb[11].mxu1 }
 0x3da   : > { %1234 = vst [vmem:[%s2184_s20] sm:$0xff] %v1188_v2  ;;  %v1191_v6 = vadd.f32 %v1598_v62, %v1190_v5 }
 0x3db   : > { %1237 = vst [vmem:[%s2184_s20 + $0x18] sm:$0xff] %v1199_v4 }
 0x3dc   : > { %1235 = vst [vmem:[%s2184_s20 + $0x8] sm:$0xff] %v1191_v6 }
 0x3de   : > { %v1725_v7 = vpop.f32.mrb[12].mxu1 }
 0x3df   : > { %v1212_v8 = vadd.f32 %v1725_v7, %v1598_v62  ;;  %v1203_v9 = vpop.f32.mrb[13].mxu1 }
 0x3e0   : > { %v1204_v10 = vadd.f32 %v1598_v62, %v1203_v9  ;;  %v1726_v11 = vpop.f32.mrb[14].mxu1 }
 0x3e1   : > { %1240 = vst [vmem:[%s2184_s20 + $0x30] sm:$0xff] %v1212_v8  ;;  %v1215_v12 = vadd.f32 %v1726_v11, %v1598_v62  ;;  %v1206_v13 = vpop.f32.mrb[15].mxu1 }
 0x3e2   : > { %1238 = vst [vmem:[%s2184_s20 + $0x20] sm:$0xff] %v1204_v10  ;;  %v1207_v14 = vadd.f32 %v1598_v62, %v1206_v13 }
 0x3e3   : > { %1241 = vst [vmem:[%s2184_s20 + $0x38] sm:$0xff] %v1215_v12 }
 0x3e4   : > { %1239 = vst [vmem:[%s2184_s20 + $0x28] sm:$0xff] %v1207_v14 }
 0x3e6   : > { %v1729_v15 = vpop.f32.mrb[16].mxu1  ;;  %1266 = sbr.rel (!%p1969_p5) target bundleno = 1005 (0x3ed), region = 106 }
 0x3e7   : > { %v1228_v16 = vadd.f32 %v1729_v15, %v1598_v62  ;;  %v1219_v17 = vpop.f32.mrb[17].mxu1 }
 0x3e8   : > { %v1220_v18 = vadd.f32 %v1598_v62, %v1219_v17  ;;  %v1730_v19 = vpop.f32.mrb[18].mxu1 }
 0x3e9   : > { %1244 = vst [vmem:[%s2184_s20 + $0x50] sm:$0xff] %v1228_v16  ;;  %v1231_v20 = vadd.f32 %v1730_v19, %v1598_v62  ;;  %v1222_v21 = vpop.f32.mrb[19].mxu1 }
 0x3ea   : > { %1242 = vst [vmem:[%s2184_s20 + $0x40] sm:$0xff] %v1220_v18  ;;  %v1223_v22 = vadd.f32 %v1598_v62, %v1222_v21 }
 0x3eb   : > { %1245 = vst [vmem:[%s2184_s20 + $0x58] sm:$0xff] %v1231_v20 }
 0x3ec   : > { %1243 = vst [vmem:[%s2184_s20 + $0x48] sm:$0xff] %v1223_v22 }
 0x3ed PF: > { %1348 = sbr.rel (!%p1969_p5) target bundleno = 1013 (0x3f5), region = 144  ;;  %s1616_s13 = sshll.u32 (%p1969_p5), %s1954_s24, 5  ;;  %v1401_v35 = vld [vmem:[%s2184_s20] sm:$0xff] (%p1969_p5)  ;;  %v1403_v36 = vld [vmem:[%s2184_s20 + $0x8] sm:$0xff] (%p1969_p5)  ;;  %v1405_v37 = vld [vmem:[%s2184_s20 + $0x10] sm:$0xff] (%p1969_p5) }
 0x3ee   : > { %s1351_s26 = scalar_lea.vmem (%p1969_p5), %s2256_s12, %s1616_s13  ;;  %v1407_v38 = vld [vmem:[%s2184_s20 + $0x18] sm:$0xff] (%p1969_p5)  ;;  %v1409_v39 = vld [vmem:[%s2184_s20 + $0x20] sm:$0xff] (%p1969_p5)  ;;  %v1411_v40 = vld [vmem:[%s2184_s20 + $0x28] sm:$0xff] (%p1969_p5) }
 0x3ef   : > { %1402 = vst [vmem:[%s1351_s26] sm:$0xff] (%p1969_p5), %v1401_v35  ;;  %1404 = vst [vmem:[%s1351_s26 + $0x8] sm:$0xff] (%p1969_p5), %v1403_v36  ;;  %v1413_v41 = vld [vmem:[%s2184_s20 + $0x30] sm:$0xff] (%p1969_p5)  ;;  %v1415_v42 = vld [vmem:[%s2184_s20 + $0x38] sm:$0xff] (%p1969_p5) }
 0x3f0   : > { %1406 = vst [vmem:[%s1351_s26 + $0x10] sm:$0xff] (%p1969_p5), %v1405_v37  ;;  %1408 = vst [vmem:[%s1351_s26 + $0x18] sm:$0xff] (%p1969_p5), %v1407_v38  ;;  %v1421_v45 = vld [vmem:[%s2184_s20 + $0x50] sm:$0xff] (%p1969_p5) }
 0x3f1   : > { %1410 = vst [vmem:[%s1351_s26 + $0x40] sm:$0xff] (%p1969_p5), %v1409_v39  ;;  %1412 = vst [vmem:[%s1351_s26 + $0x48] sm:$0xff] (%p1969_p5), %v1411_v40  ;;  %v1417_v43 = vld [vmem:[%s2184_s20 + $0x40] sm:$0xff] (%p1969_p5) }
 0x3f2   : > { %1414 = vst [vmem:[%s1351_s26 + $0x50] sm:$0xff] (%p1969_p5), %v1413_v41  ;;  %1416 = vst [vmem:[%s1351_s26 + $0x58] sm:$0xff] (%p1969_p5), %v1415_v42  ;;  %v1423_v46 = vld [vmem:[%s2184_s20 + $0x58] sm:$0xff] (%p1969_p5) }
 0x3f3   : > { %1418 = vst [vmem:[%s1351_s26 + $0x80] sm:$0xff] (%p1969_p5), %v1417_v43  ;;  %v1419_v44 = vld [vmem:[%s2184_s20 + $0x48] sm:$0xff] (%p1969_p5)  ;;  %1422 = vst [vmem:[%s1351_s26 + $0x90] sm:$0xff] (%p1969_p5), %v1421_v45 }
 0x3f4   : > { %1420 = vst [vmem:[%s1351_s26 + $0x88] sm:$0xff] %v1419_v44  ;;  %1424 = vst [vmem:[%s1351_s26 + $0x98] sm:$0xff] %v1423_v46 }
 0x3f5 PF: > { %p20_p11 = scmp.ge.s32.totalorder %s1957_s25, 4   ;;  %s2258_s21 = smov %s1866_s22 }
 0x3f6   : > { %s2259_s22 = smov %s1967_s28  ;;  %s2260_s23 = smov %s1957_s25 }
 0x3f7   :  { %22 = sbr.rel (!%p20_p11) target bundleno = 2 (0x2), region = 236 }

</bundles_post_ra>
